<compile_context>
chip_gen: v7x
topology: tpu7x:2x2x1
jax: 0.10.0
libtpu: 0.0.40
codegen_flags: <defaults>
</compile_context>

<pallas_src>
import functools

import jax
import jax.numpy as jnp
from jax.experimental import pallas as pl
from jax.experimental.pallas import tpu as pltpu


# ----------------------------- kernels -------------------------------------


def linear_kernel_single_k(x_ref, w_ref, b_ref, o_ref):
    # x_ref: (TM, K)  w_ref: (K, TN)  b_ref: (1, TN)  o_ref: (TM, TN)
    o_ref[...] = (
        jnp.dot(x_ref[...], w_ref[...], preferred_element_type=jnp.float32)
        + b_ref[...]
    ).astype(o_ref.dtype)


def linear_kernel_acc(x_ref, w_ref, b_ref, o_ref, acc_ref):
    # x_ref: (TM, TK)  w_ref: (TK, TN)  b_ref: (1, TN)  o_ref: (TM, TN)
    k = pl.program_id(2)

    @pl.when(k == 0)
    def _init():
        acc_ref[...] = jnp.zeros_like(acc_ref)

    acc_ref[...] += jnp.dot(
        x_ref[...], w_ref[...], preferred_element_type=jnp.float32
    )

    @pl.when(k == pl.num_programs(2) - 1)
    def _finalize():
        # Bias add hoisted out of the K loop (runs once per output tile).
        o_ref[...] = (acc_ref[...] + b_ref[...]).astype(o_ref.dtype)


# ----------------------------- wrapper --------------------------------------


def _round_up(x, m):
    return pl.cdiv(x, m) * m


def _tile_and_pad(dim, align, max_tile):
    """Pick a tile size (multiple of `align`, capped at `max_tile`) and a
    padded extent it evenly divides."""
    padded = _round_up(dim, align)
    tile = min(max_tile, padded)
    padded = _round_up(dim, tile)
    return tile, padded


@functools.partial(jax.jit, static_argnames=("compute_dtype",))
def last_layer_forward(x, w_t, b, compute_dtype=None):
    """Linear layer forward:  y = x @ w_t + b.

    x:   (..., n_input)
    w_t: (n_input, n_output)   (PyTorch weight, pre-transposed)
    b:   (n_output,)
    compute_dtype: optionally cast x/w_t (e.g. jnp.bfloat16) for MXU
      throughput on v6e/v7x; accumulation stays float32 either way.
    """
    orig_shape = x.shape
    n_input = orig_shape[-1]
    n_output = w_t.shape[1]
    out_dtype = x.dtype

    # nn.Linear semantics: operate on the last axis, keep leading dims.
    x2 = x.reshape(-1, n_input)
    B = x2.shape[0]

    if compute_dtype is not None:
        x2 = x2.astype(compute_dtype)
        w_t = w_t.astype(compute_dtype)

    # Tile sizes / padded extents.
    TM, M_pad = _tile_and_pad(B, 8, 512)           # sublane axis of x / out
    TK, K_pad = _tile_and_pad(n_input, 128, 512)   # lane axis of x, sublane of w
    TN, N_pad = _tile_and_pad(n_output, 128, 512)  # lane axis of w / out

    # Zero-pad: extra K columns contribute 0 to the dot; extra M/N rows/cols
    # are sliced off afterwards.
    x_p = jnp.pad(x2, ((0, M_pad - B), (0, K_pad - n_input)))
    w_p = jnp.pad(w_t, ((0, K_pad - n_input), (0, N_pad - n_output)))
    b_p = jnp.pad(
        b.reshape(1, n_output).astype(jnp.float32),
        ((0, 0), (0, N_pad - n_output)),
    )

    itemsize = jnp.dtype(x_p.dtype).itemsize
    cost = pl.CostEstimate(
        flops=2 * M_pad * K_pad * N_pad,
        transcendentals=0,
        bytes_accessed=(M_pad * K_pad + K_pad * N_pad) * itemsize
        + M_pad * N_pad * jnp.dtype(out_dtype).itemsize
        + N_pad * 4,
    )

    single_k = (K_pad == TK)

    if single_k:
        # Fast path: no K reduction axis, no accumulator scratch.
        grid_spec = pltpu.PrefetchScalarGridSpec(
            num_scalar_prefetch=0,
            grid=(M_pad // TM, N_pad // TN),
            in_specs=[
                pl.BlockSpec((TM, TK), lambda i, j: (i, 0)),
                pl.BlockSpec((TK, TN), lambda i, j: (0, j)),
                pl.BlockSpec((1, TN), lambda i, j: (0, j)),
            ],
            out_specs=pl.BlockSpec((TM, TN), lambda i, j: (i, j)),
        )
        kernel = linear_kernel_single_k
        dim_sem = ("parallel", "parallel")
    else:
        # General path: K reduction axis last ("arbitrary"), f32 accumulator.
        grid_spec = pltpu.PrefetchScalarGridSpec(
            num_scalar_prefetch=0,
            grid=(M_pad // TM, N_pad // TN, K_pad // TK),
            in_specs=[
                # x tile follows (batch, k); weight/bias ignore the batch
                # index so they stay VMEM-resident across batch tiles.
                pl.BlockSpec((TM, TK), lambda i, j, k: (i, k)),
                pl.BlockSpec((TK, TN), lambda i, j, k: (k, j)),
                pl.BlockSpec((1, TN), lambda i, j, k: (0, j)),
            ],
            out_specs=pl.BlockSpec((TM, TN), lambda i, j, k: (i, j)),
            scratch_shapes=[pltpu.VMEM((TM, TN), jnp.float32)],
        )
        kernel = linear_kernel_acc
        dim_sem = ("parallel", "parallel", "arbitrary")

    out_p = pl.pallas_call(
        kernel,
        out_shape=jax.ShapeDtypeStruct((M_pad, N_pad), out_dtype),
        grid_spec=grid_spec,
        compiler_params=pltpu.CompilerParams(
            dimension_semantics=dim_sem,
            vmem_limit_bytes=32 * 1024 * 1024,
        ),
        cost_estimate=cost,
    )(x_p, w_p, b_p)

    out = out_p[:B, :n_output]
    return out.reshape(orig_shape[:-1] + (n_output,))


# ----------------------------- test harness ---------------------------------


if __name__ == "__main__":
    # Small shapes consistent with the module: batch=2, n_input=32, n_output=16
    B, n_input, n_output = 2, 32, 16

    key = jax.random.PRNGKey(0)
    kx, kw, kb = jax.random.split(key, 3)

    x = jax.random.normal(kx, (B, n_input), dtype=jnp.float32)

    # Deterministic parameter init mimicking nn.Linear's U(-1/sqrt(fan_in), +)
    bound = 1.0 / (n_input ** 0.5)
    w = jax.random.uniform(
        kw, (n_output, n_input), dtype=jnp.float32, minval=-bound, maxval=bound
    )  # PyTorch layout (out, in)
    b = jax.random.uniform(
        kb, (n_output,), dtype=jnp.float32, minval=-bound, maxval=bound
    )

    # Pre-transpose weight for the kernel.
    w_t = jnp.transpose(w)  # (n_input, n_output)

    out = last_layer_forward(x, w_t, b)
    out = jax.block_until_ready(out)

    # Reference check against plain JAX (same semantics as torch's x @ W.T + b)
    ref = x @ w.T + b
    assert out.shape == (B, n_output)
    assert jnp.allclose(out, ref, atol=1e-5, rtol=1e-5)

    print("KERNEL_OK")
</pallas_src>

<mosaic_0001>
module attributes {stable_mosaic.version = 11 : i64} {
  func.func @linear_kernel_single_k(%arg0: i32, %arg1: i32, %arg2: memref<8x128xf32, #tpu.memory_space<vmem>>, %arg3: memref<128x128xf32, #tpu.memory_space<vmem>>, %arg4: memref<1x128xf32, #tpu.memory_space<vmem>>, %arg5: memref<8x128xf32, #tpu.memory_space<vmem>>) attributes {dimension_semantics = [#tpu.dimension_semantics<parallel>, #tpu.dimension_semantics<parallel>], iteration_bounds = array<i64: 1, 1>, scalar_prefetch = 0 : i64, scratch_operands = 0 : i64, tpu.core_type = #tpu.core_type<tc>, window_params = [{transform_indices = @transform_0, window_bounds = array<i64: 8, 128>}, {transform_indices = @transform_1, window_bounds = array<i64: 128, 128>}, {transform_indices = @transform_2, window_bounds = array<i64: 1, 128>}, {transform_indices = @transform_3, window_bounds = array<i64: 8, 128>}]} {
    %c0 = arith.constant 0 : index
    %c0_0 = arith.constant 0 : index
    %0 = vector.load %arg2[%c0, %c0_0] : memref<8x128xf32, #tpu.memory_space<vmem>>, vector<8x128xf32>
    %c0_1 = arith.constant 0 : index
    %c0_2 = arith.constant 0 : index
    %1 = vector.load %arg3[%c0_1, %c0_2] : memref<128x128xf32, #tpu.memory_space<vmem>>, vector<128x128xf32>
    %cst = arith.constant dense<0.000000e+00> : vector<8x128xf32>
    %2 = tpu.matmul %0, %1, %cst {dimension_numbers = #tpu.dot_dimension_numbers<[1], [0], [0], [1], [0, 0, 1, 1], [], []>} : vector<8x128xf32>, vector<128x128xf32>, vector<8x128xf32> -> vector<8x128xf32>
    %c0_3 = arith.constant 0 : index
    %c0_4 = arith.constant 0 : index
    %3 = vector.load %arg4[%c0_3, %c0_4] : memref<1x128xf32, #tpu.memory_space<vmem>>, vector<1x128xf32>
    %4 = vector.broadcast %3 : vector<1x128xf32> to vector<8x128xf32>
    %5 = arith.addf %2, %4 : vector<8x128xf32>
    %c0_5 = arith.constant 0 : index
    %c0_6 = arith.constant 0 : index
    %6 = vector.load %arg5[%c0_5, %c0_6] : memref<8x128xf32, #tpu.memory_space<vmem>>, vector<8x128xf32>
    tpu.vector_store %arg5[%c0_5, %c0_6], %5 {strides = array<i32>} : memref<8x128xf32, #tpu.memory_space<vmem>>, vector<8x128xf32>,
    return
  }
  func.func @transform_0(%arg0: i32, %arg1: i32) -> (i32, i32) {
    %c0_i32 = arith.constant 0 : i32
    %c0_i32_0 = arith.constant 0 : i32
    return %arg0, %c0_i32 : i32, i32
  }
  func.func @transform_1(%arg0: i32, %arg1: i32) -> (i32, i32) {
    %c0_i32 = arith.constant 0 : i32
    %c0_i32_0 = arith.constant 0 : i32
    return %c0_i32, %arg1 : i32, i32
  }
  func.func @transform_2(%arg0: i32, %arg1: i32) -> (i32, i32) {
    %c0_i32 = arith.constant 0 : i32
    %c0_i32_0 = arith.constant 0 : i32
    return %c0_i32, %arg1 : i32, i32
  }
  func.func @transform_3(%arg0: i32, %arg1: i32) -> (i32, i32) {
    %c0_i32 = arith.constant 0 : i32
    return %arg0, %arg1 : i32, i32
  }
}

</mosaic_0001>

<bundles_post_ra>
// kernel: last_layer_forward.1
= control target key start
LH: loop header
LB: loop body
LE: loop exit
PB: predicated region body
PF: predicated region fallthrough
CT: control target
= control target key end

     0   :  { %v193_v0 = vmov 0.0|0.0   ;;  %vm194_vm0 = vmmov 0   ;;  %v195_v4 = vmov 0.0   ;;  %s273_s1 = inlined_call_operand.vmem [shape: f32[128,128], index: 1, kind: input, shape index: {}]   ;;  %s274_s0 = inlined_call_operand.vmem [shape: f32[8,128], index: 0, kind: input, shape index: {}]   ;;  %s275_s2 = inlined_call_operand.vmem [shape: f32[1,128], index: 2, kind: input, shape index: {}]   ;;  %s276_s3 = inlined_call_operand.vmem [shape: f32[8,128], index: 3, kind: output, shape index: {}]  }
   0x1   :  { %166 = vmatprep.subr.bf16.mxu0 %v193_v0  ;;  %v15_v1 = vld [vmem:[%s273_s1] sm:$0xff]  ;;  %v16_v2 = vld [vmem:[%s273_s1 + $0x8] sm:$0xff]  ;;  %v17_v3 = vld [vmem:[%s273_s1 + $0x10] sm:$0xff]  ;;  %163 = vmatprep.mubr.msk.f32.mxu0 %vm194_vm0, %v195_v4 }
   0x2   :  { %v167_v5 = vpack.c.bf16 %v16_v2, %v15_v1  ;;  %v18_v6 = vld [vmem:[%s273_s1 + $0x18] sm:$0xff]  ;;  %v19_v8 = vld [vmem:[%s273_s1 + $0x20] sm:$0xff]  ;;  %v20_v9 = vld [vmem:[%s273_s1 + $0x28] sm:$0xff] }
   0x3   :  { %v170_v7 = vpack.c.bf16 %v18_v6, %v17_v3  ;;  %v173_v10 = vpack.c.bf16 %v20_v9, %v19_v8  ;;  %v21_v11 = vld [vmem:[%s273_s1 + $0x30] sm:$0xff]  ;;  %v22_v12 = vld [vmem:[%s273_s1 + $0x38] sm:$0xff]  ;;  %v23_v14 = vld [vmem:[%s273_s1 + $0x40] sm:$0xff] }
   0x4   :  { %168 = vmatpush3.bf16.msra.mxu0 %v167_v5  ;;  %v176_v13 = vpack.c.bf16 %v22_v12, %v21_v11  ;;  %v24_v15 = vld [vmem:[%s273_s1 + $0x48] sm:$0xff]  ;;  %v25_v17 = vld [vmem:[%s273_s1 + $0x50] sm:$0xff]  ;;  %v26_v18 = vld [vmem:[%s273_s1 + $0x58] sm:$0xff] }
   0x5   :  { %169 = vmatprep.subr.bf16.mxu0 %v193_v0  ;;  %v179_v16 = vpack.c.bf16 %v24_v15, %v23_v14  ;;  %v182_v19 = vpack.c.bf16 %v26_v18, %v25_v17  ;;  %v27_v20 = vld [vmem:[%s273_s1 + $0x60] sm:$0xff]  ;;  %v28_v21 = vld [vmem:[%s273_s1 + $0x68] sm:$0xff]  ;;  %v29_v23 = vld [vmem:[%s273_s1 + $0x70] sm:$0xff] }
   0x6   :  { %v185_v22 = vpack.c.bf16 %v28_v21, %v27_v20  ;;  %v30_v24 = vld [vmem:[%s273_s1 + $0x78] sm:$0xff]  ;;  %v14_v26 = vld [vmem:[%s274_s0] sm:$0xff] }
   0x7   :  { %v188_v25 = vpack.c.bf16 %v30_v24, %v29_v23  ;;  %v113_v27 = vld [vmem:[%s275_s2] ss:$0 sm:$0xff] }
   0x8   :  { %171 = vmatpush3.bf16.msra.mxu0 %v170_v7 }
   0x9   :  { %172 = vmatprep.subr.bf16.mxu0 %v193_v0 }
   0xc   :  { %174 = vmatpush3.bf16.msra.mxu0 %v173_v10 }
   0xd   :  { %175 = vmatprep.subr.bf16.mxu0 %v193_v0 }
  0x10   :  { %177 = vmatpush3.bf16.msra.mxu0 %v176_v13 }
  0x11   :  { %178 = vmatprep.subr.bf16.mxu0 %v193_v0 }
  0x14   :  { %180 = vmatpush3.bf16.msra.mxu0 %v179_v16 }
  0x15   :  { %181 = vmatprep.subr.bf16.mxu0 %v193_v0 }
  0x18   :  { %183 = vmatpush3.bf16.msra.mxu0 %v182_v19 }
  0x19   :  { %184 = vmatprep.subr.bf16.mxu0 %v193_v0 }
  0x1c   :  { %186 = vmatpush3.bf16.msra.mxu0 %v185_v22 }
  0x1d   :  { %187 = vmatprep.subr.bf16.mxu0 %v193_v0 }
  0x20   :  { %189 = vmatpush3.bf16.msra.mxu0 %v188_v25 }
  0x23   :  { %164 = vmatmul.mubr.f32.vlgmr.msra.gmra.mrb[0].mxu0 %v14_v26 }
  0xf6   :  { %v104_v28 = vpop.f32.mrb[0].mxu0 }
  0xf7   :  { %v105_v29 = vadd.f32 %v113_v27, %v104_v28  ;;  %v165_v30 = vpop.f32.mrb[1].mxu0 }
  0xf9   :  { %108 = vst [vmem:[%s276_s3] sm:$0xff] %v105_v29 }

</bundles_post_ra>
